<compile_context>
chip_gen: v6e
topology: v6e:2x2x1
jax: 0.10.0
libtpu: 0.0.40
codegen_flags: <defaults>
</compile_context>

<pallas_src>
import functools

import jax
import jax.numpy as jnp
from jax import lax
from jax.experimental import pallas as pl
from jax.experimental.pallas import tpu as pltpu


def _knn_kernel(keys_ref, val_ref, idx_ref, *, k, tq):
    """One (batch, query-tile) grid step.

    keys_ref : (1, N,  D)  all points of this batch element (resident per b)
    val_ref  : (1, k,  TQ) top-k values of neg. pairwise distance (lane-dense)
    idx_ref  : (1, k,  TQ) top-k within-batch neighbor indices   (lane-dense)
    """
    keys = keys_ref[0].astype(jnp.float32)                     # (N, D)
    n = keys.shape[0]

    # Query tile is a sublane slice of the resident keys slab (no extra DMA).
    q_start = pl.multiple_of(pl.program_id(1) * tq, tq)
    q = keys_ref[0, pl.ds(q_start, tq), :].astype(jnp.float32)  # (TQ, D)

    # scores[j, i] = 2 * <keys_j, q_i> - ||keys_j||^2
    # (per-query constant -||q_i||^2 is re-added on the selected values only)
    contract_nt = (((1,), (1,)), ((), ()))                      # contract D
    inner = lax.dot_general(keys, q, dimension_numbers=contract_nt,
                            preferred_element_type=jnp.float32)  # (N, TQ) MXU
    keys_sq = jnp.sum(keys * keys, axis=-1, keepdims=True)       # (N, 1)
    scores = 2.0 * inner - keys_sq                               # (N, TQ)

    # ||q||^2 laid out along lanes as (1, TQ): computed on the (idle) MXU to
    # avoid a (TQ, 1) -> (1, TQ) cross-lane relayout.
    ones_row = jnp.ones((1, q.shape[1]), jnp.float32)
    q_sq_lane = lax.dot_general(ones_row, q * q, dimension_numbers=contract_nt,
                                preferred_element_type=jnp.float32)  # (1, TQ)

    # (N, 1) key-index iota: broadcasts for free in the VALU compares below.
    row = lax.broadcasted_iota(jnp.int32, (n, 1), 0)
    neg_inf = jnp.float32(-jnp.inf)

    # Top-k via a stateless eligibility predicate (first-occurrence tie-break):
    # after step j, exactly the elements with score > m_j, or score == m_j and
    # row <= am_j, have been picked -- so "not yet picked" is expressible from
    # (m_j, am_j) alone and the score tile is never rewritten.
    # TODO(synk): NaN inputs would propagate through the max and make the
    # argmax fall back to the sentinel `n`; inputs are assumed finite.
    vals = []
    idxs = []
    m_prev = None
    am_prev = None
    for j in range(k):                       # k is static -> fully unrolled
        if j == 0:
            m = jnp.max(scores, axis=0, keepdims=True)                 # (1, TQ)
            hit = scores == m
        else:
            elig = (scores < m_prev) | ((scores == m_prev) & (row > am_prev))
            m = jnp.max(jnp.where(elig, scores, neg_inf),
                        axis=0, keepdims=True)                         # (1, TQ)
            hit = elig & (scores == m)
        am = jnp.min(jnp.where(hit, row, n), axis=0, keepdims=True)    # (1, TQ)
        vals.append(m - q_sq_lane)
        idxs.append(am)
        m_prev, am_prev = m, am

    val_ref[0] = jnp.concatenate(vals, axis=0)                         # (k, TQ)
    idx_ref[0] = jnp.concatenate(idxs, axis=0)                         # (k, TQ)


def _vmem_capacity_bytes():
    """Physical VMEM of the local chip (64 MiB on v7x, 128 MiB on v5e/v6e)."""
    try:
        cap = getattr(pltpu.get_tpu_info(), "vmem_capacity_bytes", None)
        if cap:
            return int(cap)
    except Exception:
        pass
    return 64 * 1024 * 1024  # conservative fallback (v7x physical)


def _kernel_vmem_bytes(n, tq, d, k):
    """Estimated VMEM footprint incl. lane padding of D and double buffers."""
    lanes_d = ((d + 127) // 128) * 128
    sub_k = ((k + 7) // 8) * 8
    keys_bufs = 2 * n * lanes_d * 4           # keys slab, double-buffered
    score_phase = 3 * n * tq * 4              # scores + selection transients
    q_tile = tq * lanes_d * 4
    out_bufs = 2 * 2 * sub_k * tq * 4         # val + idx, double-buffered
    return keys_bufs + score_phase + q_tile + out_bufs + (1 << 20)


def _pick_query_tile(n, d, k, vmem_budget):
    """Largest lane-aligned query tile whose working set fits the budget."""
    candidates = [tq for tq in (512, 256, 128) if n % tq == 0]
    for tq in candidates:
        if _kernel_vmem_bytes(n, tq, d, k) <= vmem_budget:
            return tq
    if candidates:
        return candidates[-1]     # best effort: smallest aligned tile
    return n                      # small-N case: full-extent block is legal


def knn_matrix_forward(x, batch, k=4, batch_size=None):
    """JAX/Pallas equivalent of knn_matrix.forward(x, batch).

    x     : (total_points, num_dims) float array
    batch : (total_points,) int batch assignment (sorted, equal-sized), or None
    Returns (edge_index (2, B*N*k) int32, val (1, B*N*k) float32)
    """
    if batch_size is None:
        # TODO(synk): int(batch[-1]) forces a host sync and breaks under jit
        # with a traced `batch`; pass batch_size= explicitly in that case.
        batch_size = 1 if batch is None else int(batch[-1]) + 1
    # TODO(synk): like the torch module, this assumes contiguous, equal-sized
    # batches; ragged batches would need segment handling.

    d = x.shape[-1]
    xb = x.reshape(batch_size, -1, d)
    B, N, D = xb.shape
    if k > N:
        raise ValueError("k must be <= number of points per batch element")

    cap = _vmem_capacity_bytes()
    TQ = _pick_query_tile(N, D, k, int(0.7 * cap))
    n_q_tiles = N // TQ

    need = _kernel_vmem_bytes(N, TQ, D, k)
    vmem_limit = max(16 * 1024 * 1024, min(int(0.95 * cap), int(1.25 * need)))

    kernel = functools.partial(_knn_kernel, k=k, tq=TQ)

    # Cost estimate reflects the true roofline: the top-k selection loop's
    # VPU/vld traffic (2 read passes per k-iteration over the (N, TQ) tile),
    # not just the tiny-contraction matmul.
    sel_passes = 2
    cost = pl.CostEstimate(
        flops=2 * B * N * N * D + 6 * B * k * N * N + 4 * B * N * D,
        transcendentals=0,
        bytes_accessed=4 * B * N * D + 8 * B * N * k
        + 4 * sel_passes * k * B * N * N,
    )

    val, nn_idx = pl.pallas_call(
        kernel,
        out_shape=(
            jax.ShapeDtypeStruct((B, k, N), jnp.float32),
            jax.ShapeDtypeStruct((B, k, N), jnp.int32),
        ),
        grid_spec=pltpu.PrefetchScalarGridSpec(
            num_scalar_prefetch=0,
            grid=(B, n_q_tiles),
            in_specs=[
                pl.BlockSpec((1, N, D), lambda b, q: (b, 0, 0)),  # keys (per b)
            ],
            out_specs=[
                pl.BlockSpec((1, k, TQ), lambda b, q: (b, 0, q)),
                pl.BlockSpec((1, k, TQ), lambda b, q: (b, 0, q)),
            ],
        ),
        compiler_params=pltpu.CompilerParams(
            dimension_semantics=("parallel", "parallel"),
            vmem_limit_bytes=vmem_limit),
        cost_estimate=cost,
    )(xb)

    # --- glue (plain JAX, matches the PyTorch index bookkeeping) ---
    nn_idx = jnp.transpose(nn_idx, (0, 2, 1))                  # (B, N, k)
    val = jnp.transpose(val, (0, 2, 1))                        # (B, N, k)
    start_idx = (jnp.arange(B, dtype=jnp.int32) * N).reshape(B, 1, 1)
    nn_idx = (nn_idx + start_idx).reshape(1, -1)
    val = val.reshape(1, -1)
    center_idx = jnp.repeat(jnp.arange(B * N, dtype=jnp.int32), k).reshape(1, -1)
    # TODO(synk): torch uses int64 (long) edge indices; kept int32 (JAX x64 off).
    edge_index = jnp.concatenate((nn_idx, center_idx), axis=0)
    return edge_index, val


if __name__ == "__main__":
    key = jax.random.PRNGKey(0)
    B, N, D, K = 2, 16, 8, 4                 # small shapes; k=4 (module default 16)
    x = jax.random.normal(key, (B * N, D), dtype=jnp.float32)
    batch = jnp.repeat(jnp.arange(B, dtype=jnp.int32), N)

    edge_index, val = knn_matrix_forward(x, batch, k=K)
    jax.block_until_ready((edge_index, val))

    assert edge_index.shape == (2, B * N * K)
    assert val.shape == (1, B * N * K)
    # nearest neighbor of every point should be itself (distance 0 -> max of neg_adj)
    assert bool(jnp.all(edge_index[0].reshape(B * N, K)[:, 0]
                        == jnp.arange(B * N)))
    # reference check against plain-JAX top-k of the full pairwise distance
    xb = x.reshape(B, N, D)
    inner = jnp.einsum("bnd,bmd->bnm", xb, xb)
    sq = jnp.sum(xb * xb, axis=-1, keepdims=True)
    neg_adj = 2.0 * inner - sq - jnp.swapaxes(sq, 1, 2)
    ref_val, _ = jax.lax.top_k(neg_adj, K)
    assert jnp.allclose(val.reshape(B, N, K), ref_val, atol=1e-4)
    print("KERNEL_OK")
</pallas_src>

<mosaic_0001>
module attributes {stable_mosaic.version = 11 : i64} {
  func.func @_knn_kernel(%arg0: i32, %arg1: i32, %arg2: memref<1x16x8xf32, #tpu.memory_space<vmem>>, %arg3: memref<1x4x16xf32, #tpu.memory_space<vmem>>, %arg4: memref<1x4x16xi32, #tpu.memory_space<vmem>>) attributes {dimension_semantics = [#tpu.dimension_semantics<parallel>, #tpu.dimension_semantics<parallel>], iteration_bounds = array<i64: 2, 1>, scalar_prefetch = 0 : i64, scratch_operands = 0 : i64, tpu.core_type = #tpu.core_type<tc>, window_params = [{transform_indices = @transform_0, window_bounds = array<i64: 1, 16, 8>}, {transform_indices = @transform_1, window_bounds = array<i64: 1, 4, 16>}, {transform_indices = @transform_2, window_bounds = array<i64: 1, 4, 16>}]} {
    %c0 = arith.constant 0 : index
    %c0_0 = arith.constant 0 : index
    %c0_1 = arith.constant 0 : index
    %0 = vector.load %arg2[%c0, %c0_0, %c0_1] : memref<1x16x8xf32, #tpu.memory_space<vmem>>, vector<1x16x8xf32>
    %1 = vector.shape_cast %0 : vector<1x16x8xf32> to vector<16x8xf32>
    %c16_i32 = arith.constant 16 : i32
    %2 = arith.muli %arg1, %c16_i32 : i32
    %3 = tpu.assume_multiple %2, 16 : i32
    %c0_2 = arith.constant 0 : index
    %4 = arith.index_cast %3 : i32 to index
    %c0_3 = arith.constant 0 : index
    %5 = vector.load %arg2[%c0_2, %4, %c0_3] : memref<1x16x8xf32, #tpu.memory_space<vmem>>, vector<1x16x8xf32>
    %6 = vector.shape_cast %5 : vector<1x16x8xf32> to vector<16x8xf32>
    %cst = arith.constant dense<0.000000e+00> : vector<16x16xf32>
    %7 = tpu.matmul %1, %6, %cst {dimension_numbers = #tpu.dot_dimension_numbers<[1], [1], [0], [0], [0, 0, 1, 0], [], []>} : vector<16x8xf32>, vector<16x8xf32>, vector<16x16xf32> -> vector<16x16xf32>
    %8 = arith.mulf %1, %1 : vector<16x8xf32>
    %cst_4 = arith.constant dense<0.000000e+00> : vector<16xf32>
    %9 = vector.multi_reduction <add>, %8, %cst_4 [1] : vector<16x8xf32> to vector<16xf32>
    %10 = vector.shape_cast %9 : vector<16xf32> to vector<16x1xf32>
    %cst_5 = arith.constant 2.000000e+00 : f32
    %11 = vector.broadcast %cst_5 : f32 to vector<16x16xf32>
    %12 = arith.mulf %11, %7 : vector<16x16xf32>
    %13 = vector.broadcast %10 : vector<16x1xf32> to vector<16x16xf32>
    %14 = arith.subf %12, %13 : vector<16x16xf32>
    %cst_6 = arith.constant 1.000000e+00 : f32
    %15 = vector.broadcast %cst_6 : f32 to vector<1x8xf32>
    %16 = arith.mulf %6, %6 : vector<16x8xf32>
    %cst_7 = arith.constant dense<0.000000e+00> : vector<1x16xf32>
    %17 = tpu.matmul %15, %16, %cst_7 {dimension_numbers = #tpu.dot_dimension_numbers<[1], [1], [0], [0], [0, 0, 1, 0], [], []>} : vector<1x8xf32>, vector<16x8xf32>, vector<1x16xf32> -> vector<1x16xf32>
    %18 = tpu.iota {dimensions = array<i32: 0>} : vector<16x1xi32>
    %cst_8 = arith.constant dense<0xFF800000> : vector<16xf32>
    %19 = vector.multi_reduction <maximumf>, %14, %cst_8 [0] : vector<16x16xf32> to vector<16xf32>
    %20 = vector.shape_cast %19 : vector<16xf32> to vector<1x16xf32>
    %21 = vector.broadcast %20 : vector<1x16xf32> to vector<16x16xf32>
    %22 = arith.cmpf oeq, %14, %21 : vector<16x16xf32>
    %c16_i32_9 = arith.constant 16 : i32
    %23 = vector.shape_cast %18 : vector<16x1xi32> to vector<16x1xi32>
    %24 = vector.broadcast %23 : vector<16x1xi32> to vector<16x16xi32>
    %25 = vector.broadcast %c16_i32_9 : i32 to vector<16x16xi32>
    %26 = arith.select %22, %24, %25 : vector<16x16xi1>, vector<16x16xi32>
    %cst_10 = arith.constant dense<2147483647> : vector<16xi32>
    %27 = vector.multi_reduction <minsi>, %26, %cst_10 [0] : vector<16x16xi32> to vector<16xi32>
    %28 = vector.shape_cast %27 : vector<16xi32> to vector<1x16xi32>
    %29 = arith.subf %20, %17 : vector<1x16xf32>
    %30 = vector.broadcast %20 : vector<1x16xf32> to vector<16x16xf32>
    %31 = arith.cmpf olt, %14, %30 : vector<16x16xf32>
    %32 = vector.broadcast %20 : vector<1x16xf32> to vector<16x16xf32>
    %33 = arith.cmpf oeq, %14, %32 : vector<16x16xf32>
    %34 = vector.broadcast %18 : vector<16x1xi32> to vector<16x16xi32>
    %35 = vector.broadcast %28 : vector<1x16xi32> to vector<16x16xi32>
    %36 = arith.cmpi sgt, %34, %35 : vector<16x16xi32>
    %37 = arith.andi %33, %36 : vector<16x16xi1>
    %38 = arith.ori %31, %37 : vector<16x16xi1>
    %cst_11 = arith.constant 0xFF800000 : f32
    %39 = vector.broadcast %cst_11 : f32 to vector<16x16xf32>
    %40 = arith.select %38, %14, %39 : vector<16x16xi1>, vector<16x16xf32>
    %cst_12 = arith.constant dense<0xFF800000> : vector<16xf32>
    %41 = vector.multi_reduction <maximumf>, %40, %cst_12 [0] : vector<16x16xf32> to vector<16xf32>
    %42 = vector.shape_cast %41 : vector<16xf32> to vector<1x16xf32>
    %43 = vector.broadcast %42 : vector<1x16xf32> to vector<16x16xf32>
    %44 = arith.cmpf oeq, %14, %43 : vector<16x16xf32>
    %45 = arith.andi %38, %44 : vector<16x16xi1>
    %c16_i32_13 = arith.constant 16 : i32
    %46 = vector.shape_cast %18 : vector<16x1xi32> to vector<16x1xi32>
    %47 = vector.broadcast %46 : vector<16x1xi32> to vector<16x16xi32>
    %48 = vector.broadcast %c16_i32_13 : i32 to vector<16x16xi32>
    %49 = arith.select %45, %47, %48 : vector<16x16xi1>, vector<16x16xi32>
    %cst_14 = arith.constant dense<2147483647> : vector<16xi32>
    %50 = vector.multi_reduction <minsi>, %49, %cst_14 [0] : vector<16x16xi32> to vector<16xi32>
    %51 = vector.shape_cast %50 : vector<16xi32> to vector<1x16xi32>
    %52 = arith.subf %42, %17 : vector<1x16xf32>
    %53 = vector.broadcast %42 : vector<1x16xf32> to vector<16x16xf32>
    %54 = arith.cmpf olt, %14, %53 : vector<16x16xf32>
    %55 = vector.broadcast %42 : vector<1x16xf32> to vector<16x16xf32>
    %56 = arith.cmpf oeq, %14, %55 : vector<16x16xf32>
    %57 = vector.broadcast %18 : vector<16x1xi32> to vector<16x16xi32>
    %58 = vector.broadcast %51 : vector<1x16xi32> to vector<16x16xi32>
    %59 = arith.cmpi sgt, %57, %58 : vector<16x16xi32>
    %60 = arith.andi %56, %59 : vector<16x16xi1>
    %61 = arith.ori %54, %60 : vector<16x16xi1>
    %cst_15 = arith.constant 0xFF800000 : f32
    %62 = vector.broadcast %cst_15 : f32 to vector<16x16xf32>
    %63 = arith.select %61, %14, %62 : vector<16x16xi1>, vector<16x16xf32>
    %cst_16 = arith.constant dense<0xFF800000> : vector<16xf32>
    %64 = vector.multi_reduction <maximumf>, %63, %cst_16 [0] : vector<16x16xf32> to vector<16xf32>
    %65 = vector.shape_cast %64 : vector<16xf32> to vector<1x16xf32>
    %66 = vector.broadcast %65 : vector<1x16xf32> to vector<16x16xf32>
    %67 = arith.cmpf oeq, %14, %66 : vector<16x16xf32>
    %68 = arith.andi %61, %67 : vector<16x16xi1>
    %c16_i32_17 = arith.constant 16 : i32
    %69 = vector.shape_cast %18 : vector<16x1xi32> to vector<16x1xi32>
    %70 = vector.broadcast %69 : vector<16x1xi32> to vector<16x16xi32>
    %71 = vector.broadcast %c16_i32_17 : i32 to vector<16x16xi32>
    %72 = arith.select %68, %70, %71 : vector<16x16xi1>, vector<16x16xi32>
    %cst_18 = arith.constant dense<2147483647> : vector<16xi32>
    %73 = vector.multi_reduction <minsi>, %72, %cst_18 [0] : vector<16x16xi32> to vector<16xi32>
    %74 = vector.shape_cast %73 : vector<16xi32> to vector<1x16xi32>
    %75 = arith.subf %65, %17 : vector<1x16xf32>
    %76 = vector.broadcast %65 : vector<1x16xf32> to vector<16x16xf32>
    %77 = arith.cmpf olt, %14, %76 : vector<16x16xf32>
    %78 = vector.broadcast %65 : vector<1x16xf32> to vector<16x16xf32>
    %79 = arith.cmpf oeq, %14, %78 : vector<16x16xf32>
    %80 = vector.broadcast %18 : vector<16x1xi32> to vector<16x16xi32>
    %81 = vector.broadcast %74 : vector<1x16xi32> to vector<16x16xi32>
    %82 = arith.cmpi sgt, %80, %81 : vector<16x16xi32>
    %83 = arith.andi %79, %82 : vector<16x16xi1>
    %84 = arith.ori %77, %83 : vector<16x16xi1>
    %cst_19 = arith.constant 0xFF800000 : f32
    %85 = vector.broadcast %cst_19 : f32 to vector<16x16xf32>
    %86 = arith.select %84, %14, %85 : vector<16x16xi1>, vector<16x16xf32>
    %cst_20 = arith.constant dense<0xFF800000> : vector<16xf32>
    %87 = vector.multi_reduction <maximumf>, %86, %cst_20 [0] : vector<16x16xf32> to vector<16xf32>
    %88 = vector.shape_cast %87 : vector<16xf32> to vector<1x16xf32>
    %89 = vector.broadcast %88 : vector<1x16xf32> to vector<16x16xf32>
    %90 = arith.cmpf oeq, %14, %89 : vector<16x16xf32>
    %91 = arith.andi %84, %90 : vector<16x16xi1>
    %c16_i32_21 = arith.constant 16 : i32
    %92 = vector.shape_cast %18 : vector<16x1xi32> to vector<16x1xi32>
    %93 = vector.broadcast %92 : vector<16x1xi32> to vector<16x16xi32>
    %94 = vector.broadcast %c16_i32_21 : i32 to vector<16x16xi32>
    %95 = arith.select %91, %93, %94 : vector<16x16xi1>, vector<16x16xi32>
    %cst_22 = arith.constant dense<2147483647> : vector<16xi32>
    %96 = vector.multi_reduction <minsi>, %95, %cst_22 [0] : vector<16x16xi32> to vector<16xi32>
    %97 = vector.shape_cast %96 : vector<16xi32> to vector<1x16xi32>
    %98 = arith.subf %88, %17 : vector<1x16xf32>
    %99 = tpu.concatenate %29, %52, %75, %98 in 0 : vector<1x16xf32>, vector<1x16xf32>, vector<1x16xf32>, vector<1x16xf32> -> vector<4x16xf32>
    %c0_23 = arith.constant 0 : index
    %c0_24 = arith.constant 0 : index
    %c0_25 = arith.constant 0 : index
    %100 = vector.load %arg3[%c0_23, %c0_24, %c0_25] : memref<1x4x16xf32, #tpu.memory_space<vmem>>, vector<1x4x16xf32>
    %101 = vector.shape_cast %100 : vector<1x4x16xf32> to vector<4x16xf32>
    %102 = vector.shape_cast %99 : vector<4x16xf32> to vector<1x4x16xf32>
    tpu.vector_store %arg3[%c0_23, %c0_24, %c0_25], %102 {strides = array<i32>} : memref<1x4x16xf32, #tpu.memory_space<vmem>>, vector<1x4x16xf32>,
    %103 = tpu.concatenate %28, %51, %74, %97 in 0 : vector<1x16xi32>, vector<1x16xi32>, vector<1x16xi32>, vector<1x16xi32> -> vector<4x16xi32>
    %c0_26 = arith.constant 0 : index
    %c0_27 = arith.constant 0 : index
    %c0_28 = arith.constant 0 : index
    %104 = vector.load %arg4[%c0_26, %c0_27, %c0_28] : memref<1x4x16xi32, #tpu.memory_space<vmem>>, vector<1x4x16xi32>
    %105 = vector.shape_cast %104 : vector<1x4x16xi32> to vector<4x16xi32>
    %106 = vector.shape_cast %103 : vector<4x16xi32> to vector<1x4x16xi32>
    tpu.vector_store %arg4[%c0_26, %c0_27, %c0_28], %106 {strides = array<i32>} : memref<1x4x16xi32, #tpu.memory_space<vmem>>, vector<1x4x16xi32>,
    return
  }
  func.func @transform_0(%arg0: i32, %arg1: i32) -> (i32, i32, i32) {
    %c0_i32 = arith.constant 0 : i32
    %c0_i32_0 = arith.constant 0 : i32
    %c0_i32_1 = arith.constant 0 : i32
    return %arg0, %c0_i32, %c0_i32_0 : i32, i32, i32
  }
  func.func @transform_1(%arg0: i32, %arg1: i32) -> (i32, i32, i32) {
    %c0_i32 = arith.constant 0 : i32
    %c0_i32_0 = arith.constant 0 : i32
    return %arg0, %c0_i32, %arg1 : i32, i32, i32
  }
  func.func @transform_2(%arg0: i32, %arg1: i32) -> (i32, i32, i32) {
    %c0_i32 = arith.constant 0 : i32
    %c0_i32_0 = arith.constant 0 : i32
    return %arg0, %c0_i32, %arg1 : i32, i32, i32
  }
}

</mosaic_0001>

<bundles_post_ra>
// kernel: tpu_custom_call.1
= control target key start
LH: loop header
LB: loop body
LE: loop exit
PB: predicated region body
PF: predicated region fallthrough
CT: control target
= control target key end

     0   :  { %8 = vsyncpa [#allocation3], 0  ;;  %s1212_s0 = inlined_call_operand.vmem [shape: f32[2,16,8], index: 0, kind: input, shape index: {}]   ;;  %s1213_s1 = inlined_call_operand.hbm [shape: f32[2,4,16], index: 1, kind: output, shape index: {0}]   ;;  %s1214_s2 = inlined_call_operand.hbm [shape: s32[2,4,16], index: 2, kind: output, shape index: {1}]  }
   0x1   :  { %10 = vsyncpa [#allocation3 + $0x1], 0 }
   0x2   :  { %11 = vsyncpa [#allocation5], 0 }
   0x3   :  { %13 = vsyncpa [#allocation5 + $0x1], 0  ;;  %s897_s9 = smov 0   ;;  %s899_s10 = smov 0  }
   0x4   :  { %s901_s11 = smov 0   ;;  %s903_s12 = smov 0  }
   0x5   :  { %s905_s13 = smov 0   ;;  %s907_s14 = smov 0  }
   0x6 LB: > { %s662_s15 = sadd.s32 4294967295, %s875_s14   ;;  %s663_s16 = sadd.s32 4294967294, %s875_s14   ;;  %s875_s14 = sphi %s907_s14, %s19_s14   ;;  %s871_s13 = sphi %s905_s13, %s1233_s13   ;;  %s867_s12 = sphi %s903_s12, %s1232_s12   ;;  %s863_s11 = sphi %s901_s11, %s1231_s11   ;;  %s859_s10 = sphi %s899_s10, %s1230_s10   ;;  %s855_s9 = sphi %s897_s9, %s1229_s9  }
   0x7   : > { %s31_s17 = sadd.s32 1, %s871_s13  ;;  %s66_s18 = sadd.s32 1, %s863_s11 }
   0x8   : > { %p33_p0 = scmp.ge.s32.totalorder %s31_s17, 2  ;;  %p76_p1 = scmp.ne.s32.totalorder %s863_s11, %s859_s10 }
   0x9   : > { %p77_p2 = scmp.eq.s32.totalorder %s662_s15, 1  ;;  %p82_p3 = scmp.ne.s32.totalorder %s859_s10, %s855_s9 }
   0xa   : > { %s1235_s17 = smov (%p33_p0, %s31_s17), 0  ;;  %p83_p5 = scmp.eq.s32.totalorder %s663_s16, 1 }
   0xb   : > { %p937_p4 = por %p77_p2, %p76_p1  ;;  %s61_s20 = ssub.s32 %s871_s13, %s1235_s17 }
   0xc   : > { %p666_p6 = scmp.ge.s32.totalorder %s875_s14, 1  ;;  %p64_p7 = scmp.eq.s32.totalorder %s61_s20, 0 }
   0xd   : > { %p944_p8 = por %p83_p5, %p82_p3  ;;  %p137_p9 = scmp.lt.s32.totalorder %s875_s14, 3 }
   0xe   : > { %s950_s22 = scalar_select %p64_p7, %s863_s11, %s66_s18  }
   0xf   : > { %p138_p10 = pnand %p666_p6, %p137_p9 }
  0x10   : > { %p164_p11 = scmp.lt.s32.totalorder (!%p138_p10), %s867_s12, 1  ;;  %s1106_s28 = sand.u32 (!%p138_p10), 1, %s859_s10  }
  0x11   : > { %141 = sbr.rel (%p138_p10) target bundleno = 411 (0x19b), region = 24  ;;  %s667_s29 = sshll.u32 (!%p138_p10), %s1106_s28, 2 }
  0x12   : > { %s680_s30 = sshll.u32 (!%p138_p10), %s867_s12, 6  ;;  %s156_s3 = scalar_lea.vmem (!%p138_p10), [#allocation2], %s667_s29 }
  0x13   : > { %s545_s4 = sshll.u32 (!%p138_p10), %s156_s3, 4  ;;  %s1129_s7 = scalar_lea.hbm (!%p138_p10), %s1213_s1, %s680_s30  ;;  %s1131_s4 = int_to_ptr.vmem [resolvable:$true] %s545_s4 }
  0x14   : > { %s526_s8 = scalar_lea.sflag (!%p138_p10), [#allocation3], %s1106_s28  ;;  %s769_s15 = scalar_lea.vmem (!%p138_p10), %s1131_s4, 64 }
  0x15   : > { %p770_p12 = scmp.ne.s32.totalorder (!%p138_p10), %s1131_s4, %s769_s15  ;;  %s880_s16 = smov (!%p138_p10), [#allocation2]  }
  0x16   : > { %v877_v0 = vmov 0.0   ;;  %vm878_vm0 = vmmov 0   ;;  %s165_s23 = scalar_select %p164_p11, %s867_s12, 1  ;;  %vm175_vm1 = vcmask 64512   ;;  %v879_v7 = vmov 1.0  }
  0x17   : > { %699 = vmatprep.subr.mxu1 %v877_v0  ;;  %703 = vmatprep.mubr.msk.f32.mxu1 %vm878_vm0, %v877_v0  ;;  %vm359_vm2 = vcmask 130048   ;;  %v356_v22 = vlaneseq  ;;  %p771_p13 = pnand %p770_p12, %p937_p4  ;;  %s773_s18 = sshll.u32 %s880_s16, 4  ;;  %s774_s18 = int_to_ptr.vmem [resolvable:$false] %s773_s18 }
  0x18   : > { %s684_s24 = sshll.u32 %s165_s23, 4  ;;  %s775_s20 = scalar_lea.vmem %s774_s18, 128 }
  0x19   : > { %s168_s27 = scalar_lea.vmem %s1212_s0, %s684_s24  ;;  %v978_v25 = vshrl.u32 %v356_v22, 7  ;;  %p772_p0 = pneg %p771_p13 }
  0x1a   : > { %v174_v1 = vld [vmem:[%s168_s27 + $0x8] sm:$0xff]  ;;  %v173_v2 = vld [vmem:[%s168_s27] sm:$0xff]  ;;  %p776_p1 = scmp.lt.s32.totalorder %s1131_s4, %s774_s18  ;;  %p777_p2 = scmp.lt.s32.totalorder %s775_s20, %s769_s15 }
  0x1b   : > { %692 = vmatprep.subr.msk.mxu0 %vm175_vm1, %v174_v1  ;;  %v275_v3 = vmul.f32 %v173_v2, %v173_v2  ;;  %696 = vmatprep.mubr.msk.f32.mxu0 %vm175_vm1, %v173_v2  ;;  %v276_v4 = vmul.f32 %v174_v1, %v174_v1  ;;  %v981_v28 = vadd.s32 8, %v978_v25 }
  0x1c   : > { %693 = vmatpush3.xpose.msk.msra.mxu0 %vm175_vm1, %v174_v1  ;;  %p778_p3 = por %p777_p2, %p776_p1 }
  0x1d   : > { %694 = vmatprep.subr.msk.mxu0 %vm175_vm1, %v173_v2  ;;  %700 = vmatpush3.xpose.msk.msra.mxu1 %vm175_vm1, %v276_v4  ;;  %v265_v5 = vsel %vm175_vm1, %v275_v3, 0.0  ;;  %v268_v6 = vsel %vm175_vm1, %v276_v4, 0.0 }
  0x1e   : > { %701 = vmatprep.subr.mxu1 %v877_v0  ;;  %266 = vadd.xlane.f32.xlu0 %v265_v5  ;;  %p779_p5 = pnand %p778_p3, %p772_p0 }
  0x20   : > { %695 = vmatpush3.xpose.msk.msra.mxu0 %vm175_vm1, %v173_v2 }
  0x21   : > { %702 = vmatpush3.xpose.msk.msra.mxu1 %vm175_vm1, %v275_v3 }
  0x22   : > { %269 = vadd.xlane.f32.xlu0 %v268_v6 }
  0x23   : > { %697 = vmatmul.mubr.msk.f32.vlgmr.msra.gmra.mxu0 %vm175_vm1, %v174_v1 }
  0x24   : > { %704 = vmatmul.mubr.msk.f32.vlgmr.msra.gmra.mxu1 %vm175_vm1, %v879_v7 }
  0xa7   : > { %v267_v8 = vpop.xlane.xlu0 %266 }
  0xab   : > { %v270_v10 = vpop.xlane.xlu0 %269 }
  0xe3   : > { %v698_v9 = vpop.f32.mrf.mxu0 }
  0xe4   : > { %v272_v11 = vmul.f32 2.0, %v698_v9  ;;  %v968_v12 = vpop.f32.mrf.mxu1 }
  0xe5   : > { %v254_v13 = vpop.f32.mrf.mxu0 }
  0xe6   : > { %v970_v14 = vsub.f32 %v272_v11, %v270_v10  ;;  %v271_v15 = vmul.f32 2.0, %v254_v13  ;;  %v705_v16 = vpop.f32.mrf.mxu1 }
  0xe8   : > { %v972_v17 = vsub.f32 %v271_v15, %v267_v8  ;;  %v361_v19 = vsel %vm359_vm2, %v970_v14, -inf }
  0xea   : > { %v360_v18 = vsel %vm359_vm2, %v972_v17, -inf }
  0xeb   : > { %v362_v20 = vmax.f32 %v360_v18, %v361_v19 }
  0xed   : > { %v363_v21 = vrot.slane %v362_v20, 4 }
  0xef   : > { %v364_v23 = vmax.f32 %v362_v20, %v363_v21 }
  0xf1   : > { %v365_v24 = vrot.slane %v364_v23, 2 }
  0xf3   : > { %v366_v26 = vmax.f32 %v364_v23, %v365_v24 }
  0xf5   : > { %v367_v27 = vrot.slane %v366_v26, 1 }
  0xf7   : > { %v368_v29 = vmax.f32 %v366_v26, %v367_v27 }
  0xf9   : > { %vm369_vm3 = vcmp.eq.f32.partialorder %v972_v17, %v368_v29  ;;  %vm370_vm4 = vcmp.eq.f32.partialorder %v970_v14, %v368_v29  ;;  %vm387_vm12 = vcmp.lt.f32.partialorder %v972_v17, %v368_v29  ;;  %vm388_vm14 = vcmp.lt.f32.partialorder %v970_v14, %v368_v29 }
  0xfa   : > { %v371_v30 = vsel %vm369_vm3, %v978_v25, 16  ;;  %v372_v31 = vsel %vm370_vm4, %v981_v28, 16  ;;  %v386_v55 = vsub.f32 %v368_v29, %v968_v12 }
  0xfb   : > { %v373_v32 = vsel %vm359_vm2, %v371_v30, 2147483647  ;;  %v374_v33 = vsel %vm359_vm2, %v372_v31, 2147483647 }
  0xfc   : > { %vm375_vm5 = vcmp.lt.s32.totalorder %v373_v32, %v374_v33 }
  0xfd   : > { %v376_v34 = vsel %vm375_vm5, %v373_v32, %v374_v33  ;;  %vm513_vm5 = vcmask 1040384  }
  0xfe   : > { %v377_v35 = vrot.slane %v376_v34, 4 }
 0x100   : > { %vm378_vm6 = vcmp.lt.s32.totalorder %v376_v34, %v377_v35 }
 0x101   : > { %v379_v36 = vsel %vm378_vm6, %v376_v34, %v377_v35 }
 0x102   : > { %v380_v37 = vrot.slane %v379_v36, 2 }
 0x104   : > { %vm381_vm7 = vcmp.lt.s32.totalorder %v379_v36, %v380_v37 }
 0x105   : > { %v382_v38 = vsel %vm381_vm7, %v379_v36, %v380_v37 }
 0x106   : > { %v383_v39 = vrot.slane %v382_v38, 1 }
 0x108   : > { %vm384_vm8 = vcmp.lt.s32.totalorder %v382_v38, %v383_v39 }
 0x109   : > { %v385_v40 = vsel %vm384_vm8, %v382_v38, %v383_v39 }
 0x10a   : > { %vm389_vm9 = vcmp.gt.s32.totalorder %v978_v25, %v385_v40  ;;  %vm390_vm10 = vcmp.gt.s32.totalorder %v981_v28, %v385_v40 }
 0x10b   : > { %vm391_vm11 = vmand %vm369_vm3, %vm389_vm9 }
 0x10c   : > { %vm392_vm13 = vmand %vm370_vm4, %vm390_vm10 }
 0x10d   : > { %vm1001_vm15 = vmor %vm387_vm12, %vm391_vm11 }
 0x10e   : > { %vm1005_vm0 = vmor %vm388_vm14, %vm392_vm13  ;;  %v395_v43 = vsel %vm1001_vm15, %v972_v17, -inf }
 0x10f   : > { %v396_v44 = vsel %vm1005_vm0, %v970_v14, -inf  ;;  %v397_v45 = vsel %vm359_vm2, %v395_v43, -inf }
 0x110   : > { %v398_v46 = vsel %vm359_vm2, %v396_v44, -inf }
 0x111   : > { %v399_v47 = vmax.f32 %v397_v45, %v398_v46 }
 0x113   : > { %v400_v48 = vrot.slane %v399_v47, 4 }
 0x115   : > { %v401_v49 = vmax.f32 %v399_v47, %v400_v48 }
 0x117   : > { %v402_v50 = vrot.slane %v401_v49, 2 }
 0x119   : > { %v403_v51 = vmax.f32 %v401_v49, %v402_v50 }
 0x11b   : > { %v404_v52 = vrot.slane %v403_v51, 1 }
 0x11d   : > { %v405_v53 = vmax.f32 %v403_v51, %v404_v52 }
 0x11f   : > { %vm406_vm1 = vcmp.eq.f32.partialorder %v972_v17, %v405_v53  ;;  %vm407_vm3 = vcmp.eq.f32.partialorder %v970_v14, %v405_v53  ;;  %v425_v54 = vsub.f32 %v405_v53, %v968_v12  ;;  %vm426_vm14 = vcmp.lt.f32.partialorder %v972_v17, %v405_v53 }
 0x120   : > { %vm408_vm4 = vmand %vm1001_vm15, %vm406_vm1 }
 0x121   : > { %vm409_vm6 = vmand %vm1005_vm0, %vm407_vm3  ;;  %v410_v56 = vsel %vm408_vm4, %v978_v25, 16  ;;  %v505_v57 = vrot.slane %v425_v54, 7  ;;  %vm427_vm0 = vcmp.lt.f32.partialorder %v970_v14, %v405_v53 }
 0x122   : > { %v411_v58 = vsel %vm409_vm6, %v981_v28, 16  ;;  %v412_v59 = vsel %vm359_vm2, %v410_v56, 2147483647 }
 0x123   : > { %v413_v60 = vsel %vm359_vm2, %v411_v58, 2147483647  ;;  %v1034_v61 = vsel %vm513_vm5, %v386_v55, %v505_v57 }
 0x124   : > { %vm414_vm7 = vcmp.lt.s32.totalorder %v412_v59, %v413_v60 }
 0x125   : > { %v415_v62 = vsel %vm414_vm7, %v412_v59, %v413_v60 }
 0x126   : > { %v416_v63 = vrot.slane %v415_v62, 4 }
 0x128   : > { %vm417_vm8 = vcmp.lt.s32.totalorder %v415_v62, %v416_v63 }
 0x129   : > { %v418_v0 = vsel %vm417_vm8, %v415_v62, %v416_v63 }
 0x12a   : > { %v419_v1 = vrot.slane %v418_v0, 2 }
 0x12c   : > { %vm420_vm9 = vcmp.lt.s32.totalorder %v418_v0, %v419_v1 }
 0x12d   : > { %v421_v2 = vsel %vm420_vm9, %v418_v0, %v419_v1 }
 0x12e   : > { %v422_v3 = vrot.slane %v421_v2, 1 }
 0x130   : > { %vm423_vm10 = vcmp.lt.s32.totalorder %v421_v2, %v422_v3 }
 0x131   : > { %v424_v4 = vsel %vm423_vm10, %v421_v2, %v422_v3 }
 0x132   : > { %vm428_vm11 = vcmp.gt.s32.totalorder %v978_v25, %v424_v4  ;;  %vm429_vm12 = vcmp.gt.s32.totalorder %v981_v28, %v424_v4  ;;  %v1039_v5 = vsel %vm513_vm5, %v385_v40, %v424_v4 }
 0x133   : > { %vm430_vm13 = vmand %vm406_vm1, %vm428_vm11 }
 0x134   : > { %vm431_vm15 = vmand %vm407_vm3, %vm429_vm12 }
 0x135   : > { %vm1047_vm4 = vmor %vm426_vm14, %vm430_vm13 }
 0x136   : > { %vm1051_vm6 = vmor %vm427_vm0, %vm431_vm15  ;;  %v434_v8 = vsel %vm1047_vm4, %v972_v17, -inf }
 0x137   : > { %v435_v9 = vsel %vm1051_vm6, %v970_v14, -inf  ;;  %v436_v10 = vsel %vm359_vm2, %v434_v8, -inf }
 0x138   : > { %v437_v11 = vsel %vm359_vm2, %v435_v9, -inf }
 0x139   : > { %v438_v13 = vmax.f32 %v436_v10, %v437_v11 }
 0x13b   : > { %v439_v15 = vrot.slane %v438_v13, 4 }
 0x13d   : > { %v440_v16 = vmax.f32 %v438_v13, %v439_v15 }
 0x13f   : > { %v441_v18 = vrot.slane %v440_v16, 2 }
 0x141   : > { %v442_v19 = vmax.f32 %v440_v16, %v441_v18 }
 0x143   : > { %v443_v20 = vrot.slane %v442_v19, 1 }
 0x145   : > { %v444_v21 = vmax.f32 %v442_v19, %v443_v20 }
 0x147   : > { %vm445_vm1 = vcmp.eq.f32.partialorder %v972_v17, %v444_v21  ;;  %vm446_vm3 = vcmp.eq.f32.partialorder %v970_v14, %v444_v21  ;;  %vm465_vm15 = vcmp.lt.f32.partialorder %v972_v17, %v444_v21  ;;  %v464_v46 = vsub.f32 %v444_v21, %v968_v12 }
 0x148   : > { %vm447_vm5 = vmand %vm1047_vm4, %vm445_vm1  ;;  %vm466_vm4 = vcmp.lt.f32.partialorder %v970_v14, %v444_v21 }
 0x149   : > { %vm448_vm7 = vmand %vm1051_vm6, %vm446_vm3  ;;  %v449_v22 = vsel %vm447_vm5, %v978_v25, 16  ;;  %v508_v49 = vrot.slane %v464_v46, 6 }
 0x14a   : > { %v450_v23 = vsel %vm448_vm7, %v981_v28, 16  ;;  %v451_v24 = vsel %vm359_vm2, %v449_v22, 2147483647  ;;  %vm515_vm7 = vcmask 1041408  }
 0x14b   : > { %v452_v26 = vsel %vm359_vm2, %v450_v23, 2147483647 }
 0x14c   : > { %vm453_vm8 = vcmp.lt.s32.totalorder %v451_v24, %v452_v26 }
 0x14d   : > { %v454_v27 = vsel %vm453_vm8, %v451_v24, %v452_v26 }
 0x14e   : > { %v455_v29 = vrot.slane %v454_v27, 4 }
 0x150   : > { %vm456_vm9 = vcmp.lt.s32.totalorder %v454_v27, %v455_v29 }
 0x151   : > { %v457_v30 = vsel %vm456_vm9, %v454_v27, %v455_v29  ;;  %vm517_vm9 = vcmask 1042432  }
 0x152   : > { %v458_v31 = vrot.slane %v457_v30, 2 }
 0x154   : > { %vm459_vm10 = vcmp.lt.s32.totalorder %v457_v30, %v458_v31 }
 0x155   : > { %v460_v32 = vsel %vm459_vm10, %v457_v30, %v458_v31 }
 0x156   : > { %v461_v33 = vrot.slane %v460_v32, 1 }
 0x158   : > { %vm462_vm11 = vcmp.lt.s32.totalorder %v460_v32, %v461_v33 }
 0x159   : > { %v1077_v34 = vsel %vm462_vm11, %v460_v32, %v461_v33  ;;  %vm519_vm11 = vcmask 125952  }
 0x15a   : > { %vm467_vm12 = vcmp.gt.s32.totalorder %v978_v25, %v1077_v34  ;;  %vm468_vm13 = vcmp.gt.s32.totalorder %v981_v28, %v1077_v34 }
 0x15b   : > { %vm469_vm14 = vmand %vm445_vm1, %vm467_vm12 }
 0x15c   : > { %vm470_vm0 = vmand %vm446_vm3, %vm468_vm13 }
 0x15d   : > { %vm1089_vm6 = vmor %vm465_vm15, %vm469_vm14 }
 0x15e   : > { %vm1093_vm5 = vmor %vm466_vm4, %vm470_vm0  ;;  %v473_v37 = vsel %vm1089_vm6, %v972_v17, -inf }
 0x15f   : > { %v474_v38 = vsel %vm1093_vm5, %v970_v14, -inf  ;;  %v475_v39 = vsel %vm359_vm2, %v473_v37, -inf }
 0x160   : > { %v476_v40 = vsel %vm359_vm2, %v474_v38, -inf }
 0x161   : > { %v477_v41 = vmax.f32 %v475_v39, %v476_v40 }
 0x163   : > { %v478_v42 = vrot.slane %v477_v41, 4 }
 0x165   : > { %v479_v43 = vmax.f32 %v477_v41, %v478_v42 }
 0x167   : > { %v480_v44 = vrot.slane %v479_v43, 2 }
 0x169   : > { %v481_v45 = vmax.f32 %v479_v43, %v480_v44 }
 0x16b   : > { %v482_v47 = vrot.slane %v481_v45, 1 }
 0x16d   : > { %v483_v48 = vmax.f32 %v481_v45, %v482_v47 }
 0x16f   : > { %vm484_vm1 = vcmp.eq.f32.partialorder %v972_v17, %v483_v48  ;;  %vm485_vm3 = vcmp.eq.f32.partialorder %v970_v14, %v483_v48  ;;  %v503_v50 = vsub.f32 %v483_v48, %v968_v12  ;;  %v516_v14 = vsel %vm515_vm7, %v1034_v61, %v508_v49 }
 0x170   : > { %vm486_vm8 = vmand %vm1089_vm6, %vm484_vm1 }
 0x171   : > { %vm487_vm10 = vmand %vm1093_vm5, %vm485_vm3  ;;  %v488_v17 = vsel %vm486_vm8, %v978_v25, 16  ;;  %v511_v51 = vrot.slane %v503_v50, 5 }
 0x172   : > { %v489_v12 = vsel %vm487_vm10, %v981_v28, 16  ;;  %v490_v25 = vsel %vm359_vm2, %v488_v17, 2147483647 }
 0x173   : > { %v518_v52 = vsel %vm517_vm9, %v516_v14, %v511_v51  ;;  %v491_v28 = vsel %vm359_vm2, %v489_v12, 2147483647 }
 0x174   : > { %520 = vst.msk [vmem:[%s156_s3] sm:$0xf] %vm519_vm11, %v518_v52  ;;  %vm492_vm12 = vcmp.lt.s32.totalorder %v490_v25, %v491_v28 }
 0x175   : > { %782 = shalt.err (!%p779_p5)
}
 0x176   : > { %s783_s23 = scalar_lea.hbm %s1129_s7, 64  ;;  %s787_s26 = scalar_lea.hbm %s1213_s1, 128 }
 0x177   : > { %p784_p6 = scmp.ne.s32.totalorder %s1129_s7, %s783_s23  ;;  %p788_p10 = scmp.lt.s32.totalorder %s1129_s7, %s1213_s1 }
 0x178   : > { %p789_p11 = scmp.lt.s32.totalorder %s787_s26, %s783_s23 }
 0x179   : > { %p785_p7 = pnand %p784_p6, %p937_p4 }
 0x17a   : > { %p790_p12 = por %p789_p11, %p788_p10 }
 0x17b   : > { %p786_p9 = pneg %p785_p7 }
 0x17d   : > { %p791_p13 = pnand %p790_p12, %p786_p9 }
 0x17f   : > { %794 = shalt.err (!%p791_p13)
}
 0x180   : > { %706 = dma.vmem_to_hbm [thread:$0]  (%p937_p4), %s1131_s4, 64, %s1129_s7, %s526_s8   ;;  %v493_v53 = vsel %vm492_vm12, %v490_v25, %v491_v28  ;;  %v522_v60 = vsel %vm515_vm7, %v1039_v5, %v1077_v34 }
 0x181   : > { %v494_v54 = vrot.slane %v493_v53, 4  ;;  %s163_s5 = scalar_lea.vmem [#allocation4], %s667_s29  ;;  %s1169_s8 = scalar_lea.hbm %s1214_s2, %s680_s30 }
 0x182   : > { %s559_s6 = sshll.u32 %s163_s5, 4  ;;  %s531_s15 = scalar_lea.sflag [#allocation5], %s1106_s28  ;;  %s560_s6 = int_to_ptr.vmem [resolvable:$true] %s559_s6 }
 0x183   : > { %vm495_vm2 = vcmp.lt.s32.totalorder %v493_v53, %v494_v54  ;;  %s795_s29 = scalar_lea.vmem %s560_s6, 64  ;;  %s881_s16 = smov [#allocation4]  }
 0x184   : > { %v496_v55 = vsel %vm495_vm2, %v493_v53, %v494_v54  ;;  %p796_p0 = scmp.ne.s32.totalorder %s560_s6, %s795_s29  ;;  %s799_s18 = sshll.u32 %s881_s16, 4  ;;  %s800_s18 = int_to_ptr.vmem [resolvable:$false] %s799_s18 }
 0x185   : > { %v497_v56 = vrot.slane %v496_v55, 2  ;;  %s801_s12 = scalar_lea.vmem %s800_s18, 128  ;;  %p802_p3 = scmp.lt.s32.totalorder %s560_s6, %s800_s18 }
 0x186   : > { %p797_p1 = pnand %p796_p0, %p937_p4  ;;  %p803_p5 = scmp.lt.s32.totalorder %s801_s12, %s795_s29 }
 0x187   : > { %vm498_vm13 = vcmp.lt.s32.totalorder %v496_v55, %v497_v56 }
 0x188   : > { %v499_v57 = vsel %vm498_vm13, %v496_v55, %v497_v56  ;;  %p798_p2 = pneg %p797_p1  ;;  %p804_p6 = por %p803_p5, %p802_p3 }
 0x189   : > { %v500_v58 = vrot.slane %v499_v57, 1 }
 0x18a   : > { %p805_p7 = pnand %p804_p6, %p798_p2 }
 0x18b   : > { %vm501_vm14 = vcmp.lt.s32.totalorder %v499_v57, %v500_v58 }
 0x18c   : > { %v502_v59 = vsel %vm501_vm14, %v499_v57, %v500_v58 }
 0x18d   : > { %v523_v61 = vsel %vm517_vm9, %v522_v60, %v502_v59 }
 0x18e   : > { %524 = vst.msk [vmem:[%s163_s5] sm:$0xf] %vm519_vm11, %v523_v61 }
 0x18f   : > { %808 = shalt.err (!%p805_p7)
}
 0x190   : > { %s809_s30 = scalar_lea.hbm %s1169_s8, 64  ;;  %s813_s23 = scalar_lea.hbm %s1214_s2, 128 }
 0x191   : > { %p810_p9 = scmp.ne.s32.totalorder %s1169_s8, %s809_s30  ;;  %p814_p12 = scmp.lt.s32.totalorder %s1169_s8, %s1214_s2 }
 0x192   : > { %p815_p13 = scmp.lt.s32.totalorder %s813_s23, %s809_s30 }
 0x193   : > { %p811_p10 = pnand %p810_p9, %p937_p4 }
 0x194   : > { %p816_p0 = por %p815_p13, %p814_p12 }
 0x195   : > { %p812_p11 = pneg %p811_p10 }
 0x197   : > { %p817_p1 = pnand %p816_p0, %p812_p11 }
 0x199   : > { %820 = shalt.err (!%p817_p1)
}
 0x19a   : > { %707 = dma.vmem_to_hbm [thread:$0]  (%p937_p4), %s560_s6, 64, %s1169_s8, %s531_s15  }
 0x19b PF: > { %p717_p2 = scmp.ge.s32.totalorder %s875_s14, 2  ;;  %s571_s26 = sand.u32 1, %s855_s9  }
 0x19c   : > { %s572_s27 = scalar_lea.sflag [#allocation3], %s571_s26 }
 0x19d   : > { %p711_p3 = pnand %p717_p2, %p944_p8 }
 0x19f   : > { %p712_p5 = pneg %p711_p3 }
 0x1a1   : > { %846 = dma.done.wait (%p712_p5), %s572_s27, 64  }
 0x1a2   : > { %848 = vsyncadd (%p712_p5), %s572_s27, 4294967232  ;;  %s581_s3 = scalar_lea.sflag [#allocation5], %s571_s26 }
 0x1a3   : > { %850 = dma.done.wait (%p712_p5), %s581_s3, 64  }
 0x1a4   : > { %852 = vsyncadd (%p712_p5), %s581_s3, 4294967232  ;;  %s19_s14 = sadd.s32 1, %s875_s14   ;;  %s1229_s9 = smov %s859_s10 }
 0x1a5   : > { %p16_p6 = scmp.ge.s32.totalorder %s19_s14, 4   ;;  %s1230_s10 = smov %s863_s11 }
 0x1a6   : > { %s1231_s11 = smov %s950_s22  ;;  %s1232_s12 = smov %s871_s13 }
 0x1a7   : > { %s1233_s13 = smov %s1235_s17  ;;  %18 = sbr.rel (!%p16_p6) target bundleno = 6 (0x6), region = 77 }
 0x1ac   :  { %586 = vsyncpa [#allocation3], 1 }
 0x1ad   :  { %588 = vsyncpa [#allocation3 + $0x1], 1 }
 0x1ae   :  { %589 = vsyncpa [#allocation5], 1 }
 0x1af   :  { %591 = vsyncpa [#allocation5 + $0x1], 1 }

</bundles_post_ra>
